<compile_context>
chip_gen: v5e
topology: v5e:2x2
jax: 0.10.0
libtpu: 0.0.40
codegen_flags: <defaults>
</compile_context>

<pallas_src>
import math

import jax
import jax.numpy as jnp
from jax.experimental import pallas as pl
from jax.experimental.pallas import tpu as pltpu


def _block_diag_kernel(x_ref, mask_ref, o_ref):
    # x_ref   : (bt, tn, M)   -- the tn//M diagonal blocks owned by this column tile
    # mask_ref: (tn, tn)      -- 0/1 block-diagonal mask (constant across the grid)
    # o_ref   : (bt, NM, tn)  -- output column tile
    bt, tn, M = x_ref.shape
    _, NM, _ = o_ref.shape
    n_rep = tn // M

    x = x_ref[...]                                  # (bt, tn, M)
    # tiled[b, i*M + p, j*M + q] = x[b, i*M + p, q] = input[b, i, p, q]
    tiled = jnp.tile(x, (1, 1, n_rep))              # (bt, tn, tn)
    diag = tiled * mask_ref[...][None, :, :]        # single masked product, no where/zeros temp

    if tn == NM:
        # Whole output row-span of this batch tile in one lane-dense store.
        o_ref[...] = diag
    else:
        # Column-tiled path: only rows [j*tn, (j+1)*tn) carry data; rest is zero.
        j = pl.program_id(1)
        o_ref[...] = jnp.zeros_like(o_ref)
        row_start = pl.multiple_of(j * tn, tn)
        o_ref[:, pl.ds(row_start, tn), :] = diag


def _choose_col_tile(NM, M, itemsize, budget):
    """Largest column tile tn (multiple of lcm(M,128), dividing NM) within budget."""
    if NM * NM * itemsize <= budget:
        return NM
    base = (M * 128) // math.gcd(M, 128)
    if NM % base != 0:
        # Cannot column-tile cleanly; fall back to full width (may be large).
        return NM
    best = base
    for mult in range(1, NM // base + 1):
        cand = base * mult
        if NM % cand == 0 and NM * cand * itemsize <= budget:
            best = cand
    return best


def _choose_batch_tile(B, bytes_per_item_tile, budget):
    """Batch tile: within budget, divides B, and leaves >= 2 grid steps when B >= 2."""
    bt_cap = B // 2 if B >= 2 else 1
    bt = max(1, min(bt_cap, budget // max(1, bytes_per_item_tile)))
    while B % bt != 0:
        bt -= 1
    return bt


def spd_diag(x, *, batch_tile=None, col_tile=None):
    """JAX/Pallas equivalent of SPDDiag().forward(x) for x of shape [B, N, M, M]."""
    B, N, M, M2 = x.shape
    assert M == M2, "blocks must be square"
    NM = N * M
    itemsize = jnp.dtype(x.dtype).itemsize

    # Contiguous row-major view: (B, N, M, M) -> (B, N*M, M). Free reshape.
    x2 = x.reshape(B, NM, M)

    # ~4 MiB per-step output tile: amortizes step overhead on v7x, already past
    # the roofline knee on v5e/v6e.
    budget = 4 * 1024 * 1024

    tn = col_tile if col_tile is not None else _choose_col_tile(NM, M, itemsize, budget)
    assert NM % tn == 0 and tn % M == 0, "col_tile must divide N*M and be a multiple of M"
    assert tn == NM or (tn % 128 == 0), "column tile must be lane-aligned (multiple of 128)"

    bytes_per_item_tile = NM * tn * itemsize
    if batch_tile is None:
        bt = _choose_batch_tile(B, bytes_per_item_tile, budget)
    else:
        bt = batch_tile
        assert B % bt == 0, "batch_tile must divide B"

    grid = (B // bt, NM // tn)

    # Precompute the 0/1 block-diagonal mask once on the host; constant input.
    row_blk = jnp.arange(tn, dtype=jnp.int32) // M
    mask = (row_blk[:, None] == row_blk[None, :]).astype(x.dtype)     # (tn, tn)

    # VMEM accounting: double-buffered in/out tiles + mask + in-kernel temporaries
    # (tiled copy + masked product), with 2x headroom for Mosaic scratch.
    in_tile_b = bt * tn * M * itemsize
    out_tile_b = bt * NM * tn * itemsize
    mask_b = tn * tn * itemsize
    temps_b = 2 * bt * tn * tn * itemsize
    footprint = 2 * (in_tile_b + out_tile_b + mask_b) + temps_b
    vmem_limit = int(min(48 * 1024 * 1024, max(32 * 1024 * 1024, 2 * footprint)))

    return pl.pallas_call(
        _block_diag_kernel,
        out_shape=jax.ShapeDtypeStruct((B, NM, NM), x.dtype),
        grid=grid,
        in_specs=[
            # Only the rows overlapping column tile j are fetched.
            pl.BlockSpec((bt, tn, M), lambda b, j: (b, j, 0)),
            # Constant block -> effectively DMA'd once per core.
            pl.BlockSpec((tn, tn), lambda b, j: (0, 0)),
        ],
        out_specs=pl.BlockSpec((bt, NM, tn), lambda b, j: (b, 0, j)),
        compiler_params=pltpu.CompilerParams(
            dimension_semantics=("parallel", "parallel"),
            vmem_limit_bytes=vmem_limit,
        ),
    )(x2, mask)


def _reference_block_diag(x):
    # Pure-JAX reference for correctness check.
    B, N, M, _ = x.shape
    out = jnp.zeros((B, N * M, N * M), x.dtype)
    for i in range(N):
        out = out.at[:, i * M:(i + 1) * M, i * M:(i + 1) * M].set(x[:, i])
    return out


if __name__ == "__main__":
    # SPDDiag has no parameters; just build deterministic inputs.
    B, N, M = 2, 4, 16
    key = jax.random.PRNGKey(0)
    x = jax.random.normal(key, (B, N, M, M), dtype=jnp.float32)

    out = spd_diag(x)
    out = jax.block_until_ready(out)

    ref = _reference_block_diag(x)
    assert out.shape == (B, N * M, N * M)
    assert jnp.allclose(out, ref), "Pallas output mismatch vs reference"

    print("KERNEL_OK")
</pallas_src>

<mosaic_0001>
module attributes {stable_mosaic.version = 11 : i64} {
  func.func @_block_diag_kernel(%arg0: i32, %arg1: i32, %arg2: memref<1x64x16xf32, #tpu.memory_space<vmem>>, %arg3: memref<64x64xf32, #tpu.memory_space<vmem>>, %arg4: memref<1x64x64xf32, #tpu.memory_space<vmem>>) attributes {dimension_semantics = [#tpu.dimension_semantics<parallel>, #tpu.dimension_semantics<parallel>], iteration_bounds = array<i64: 2, 1>, scalar_prefetch = 0 : i64, scratch_operands = 0 : i64, tpu.core_type = #tpu.core_type<tc>, window_params = [{transform_indices = @transform_0, window_bounds = array<i64: 1, 64, 16>}, {pipeline_mode = #tpu.pipeline_mode<synchronous>, transform_indices = @transform_1, window_bounds = array<i64: 64, 64>}, {transform_indices = @transform_2, window_bounds = array<i64: 1, 64, 64>}]} {
    %c0 = arith.constant 0 : index
    %c0_0 = arith.constant 0 : index
    %c0_1 = arith.constant 0 : index
    %0 = vector.load %arg2[%c0, %c0_0, %c0_1] : memref<1x64x16xf32, #tpu.memory_space<vmem>>, vector<1x64x16xf32>
    %1 = tpu.concatenate %0, %0, %0, %0 in 2 : vector<1x64x16xf32>, vector<1x64x16xf32>, vector<1x64x16xf32>, vector<1x64x16xf32> -> vector<1x64x64xf32>
    %c0_2 = arith.constant 0 : index
    %c0_3 = arith.constant 0 : index
    %2 = vector.load %arg3[%c0_2, %c0_3] : memref<64x64xf32, #tpu.memory_space<vmem>>, vector<64x64xf32>
    %3 = vector.shape_cast %2 : vector<64x64xf32> to vector<1x64x64xf32>
    %4 = arith.mulf %1, %3 : vector<1x64x64xf32>
    %c0_4 = arith.constant 0 : index
    %c0_5 = arith.constant 0 : index
    %c0_6 = arith.constant 0 : index
    %5 = vector.load %arg4[%c0_4, %c0_5, %c0_6] : memref<1x64x64xf32, #tpu.memory_space<vmem>>, vector<1x64x64xf32>
    tpu.vector_store %arg4[%c0_4, %c0_5, %c0_6], %4 {strides = array<i32>} : memref<1x64x64xf32, #tpu.memory_space<vmem>>, vector<1x64x64xf32>,
    return
  }
  func.func @transform_0(%arg0: i32, %arg1: i32) -> (i32, i32, i32) {
    %c0_i32 = arith.constant 0 : i32
    %c0_i32_0 = arith.constant 0 : i32
    return %arg0, %arg1, %c0_i32 : i32, i32, i32
  }
  func.func @transform_1(%arg0: i32, %arg1: i32) -> (i32, i32) {
    %c0_i32 = arith.constant 0 : i32
    %c0_i32_0 = arith.constant 0 : i32
    %c0_i32_1 = arith.constant 0 : i32
    return %c0_i32, %c0_i32_0 : i32, i32
  }
  func.func @transform_2(%arg0: i32, %arg1: i32) -> (i32, i32, i32) {
    %c0_i32 = arith.constant 0 : i32
    %c0_i32_0 = arith.constant 0 : i32
    return %arg0, %c0_i32, %arg1 : i32, i32, i32
  }
}

</mosaic_0001>

<bundles_post_ra>
// kernel: tpu_custom_call.1
= control target key start
LH: loop header
LB: loop body
LE: loop exit
PB: predicated region body
PF: predicated region fallthrough
CT: control target
= control target key end

     0   :  { %7 = vsyncpa [#allocation3], 0  ;;  %s792_s0 = inlined_call_operand.vmem [shape: f32[2,64,16], index: 0, kind: input, shape index: {}]   ;;  %s793_s1 = inlined_call_operand.vmem [shape: f32[64,64], index: 1, kind: input, shape index: {}]   ;;  %s794_s2 = inlined_call_operand.hbm [shape: f32[2,64,64], index: 2, kind: output, shape index: {}]  }
   0x1   :  { %9 = vsyncpa [#allocation3 + $0x1], 0  ;;  %s582_s9 = smov 0   ;;  %s584_s10 = smov 0  }
   0x2   :  { %s586_s11 = smov 0   ;;  %s588_s12 = smov 0  }
   0x3   :  { %s590_s13 = smov 0   ;;  %s592_s14 = smov 0  }
   0x4 LB: > { %s407_s15 = sadd.s32 4294967295, %s560_s14   ;;  %s408_s16 = sadd.s32 4294967294, %s560_s14   ;;  %s560_s14 = sphi %s592_s14, %s15_s14   ;;  %s556_s13 = sphi %s590_s13, %s801_s13   ;;  %s552_s12 = sphi %s588_s12, %s800_s12   ;;  %s548_s11 = sphi %s586_s11, %s799_s11   ;;  %s544_s10 = sphi %s584_s10, %s798_s10   ;;  %s540_s9 = sphi %s582_s9, %s797_s9  }
   0x5   : > { %s27_s17 = sadd.s32 1, %s556_s13  ;;  %s85_s18 = sadd.s32 1, %s548_s11 }
   0x6   : > { %p29_p0 = scmp.ge.s32.totalorder %s27_s17, 2  ;;  %p95_p1 = scmp.ne.s32.totalorder %s548_s11, %s544_s10 }
   0x7   : > { %p96_p2 = scmp.eq.s32.totalorder %s407_s15, 1  ;;  %p101_p3 = scmp.ne.s32.totalorder %s544_s10, %s540_s9 }
   0x8   : > { %s803_s17 = smov (%p29_p0, %s27_s17), 0  ;;  %p102_p5 = scmp.eq.s32.totalorder %s408_s16, 1 }
   0x9   : > { %p622_p4 = por %p96_p2, %p95_p1  ;;  %s80_s20 = ssub.s32 %s556_s13, %s803_s17 }
   0xa   : > { %p411_p6 = scmp.ge.s32.totalorder %s560_s14, 1  ;;  %p83_p7 = scmp.eq.s32.totalorder %s80_s20, 0 }
   0xb   : > { %p629_p8 = por %p102_p5, %p101_p3  ;;  %p136_p9 = scmp.lt.s32.totalorder %s560_s14, 3 }
   0xc   : > { %s635_s22 = scalar_select %p83_p7, %s548_s11, %s85_s18  }
   0xd   : > { %p137_p10 = pnand %p411_p6, %p136_p9 }
   0xe   : > { %p163_p11 = scmp.lt.s32.totalorder (!%p137_p10), %s552_s12, 1  ;;  %s562_s28 = smov (!%p137_p10), 16  }
   0xf   : > { %140 = sbr.rel (%p137_p10) target bundleno = 204 (0xcc), region = 28  ;;  %s563_s29 = smov (!%p137_p10), 32  }
  0x10   : > { %s564_s30 = smov (!%p137_p10), 48   ;;  %s159_s3 = sand.u32 (!%p137_p10), 1, %s544_s10  }
  0x11   : > { %s412_s4 = sshll.u32 (!%p137_p10), %s159_s3, 6  ;;  %s313_s18 = scalar_lea.sflag (!%p137_p10), [#allocation3], %s159_s3 }
  0x12   : > { %s685_s7 = scalar_lea.vmem (!%p137_p10), [#allocation2], %s412_s4  ;;  %s502_s26 = scalar_lea.hbm (!%p137_p10), %s794_s2, 128 }
  0x13   : > { %s326_s15 = sshll.u32 (!%p137_p10), %s685_s7, 4  ;;  %s327_s15 = int_to_ptr.vmem [resolvable:$true] %s326_s15 }
  0x14   : > { %s164_s23 = scalar_select %p163_p11, %s552_s12, 1  ;;  %vm260_vm0 = vcmask 130048   ;;  %vm278_vm1 = vcmask 392192   ;;  %vm269_vm2 = vcmask 261120   ;;  %v288_v23 = vld [vmem:[%s793_s1 + $0x8] sm:$0xff]  ;;  %vm303_vm3 = vcmask 523264  }
  0x15   : > { %v291_v31 = vld [vmem:[%s793_s1 + $0x20] sm:$0xff]  ;;  %v294_v42 = vld [vmem:[%s793_s1 + $0x38] sm:$0xff]  ;;  %v289_v51 = vld [vmem:[%s793_s1 + $0x10] sm:$0xff] }
  0x16   : > { %s420_s24 = sshll.u32 %s164_s23, 6  ;;  %v287_v36 = vld [vmem:[%s793_s1] sm:$0xff]  ;;  %v290_v50 = vld [vmem:[%s793_s1 + $0x18] sm:$0xff]  ;;  %v293_v62 = vld [vmem:[%s793_s1 + $0x30] sm:$0xff] }
  0x17   : > { %s170_s27 = scalar_lea.vmem %s792_s0, %s420_s24  ;;  %v292_v63 = vld [vmem:[%s793_s1 + $0x28] sm:$0xff] }
  0x18   : > { %v642_v0 = vld [vmem:[%s170_s27 + $0x10] sm:$0xff]  ;;  %v644_v1 = vld [vmem:[%s170_s27] sm:$0xff]  ;;  %v648_v3 = vld [vmem:[%s170_s27 + $0x18] sm:$0xff] }
  0x19   : > { %192 = vrot.lane.b32.xlu1 %v642_v0, %s562_s28  ;;  %188 = vrot.lane.b32.xlu0 %v644_v1, %s562_s28  ;;  %v176_v2 = vld [vmem:[%s170_s27 + $0x20] sm:$0xff]  ;;  %v173_v4 = vld [vmem:[%s170_s27 + $0x8] sm:$0xff] }
  0x1a   : > { %196 = vrot.lane.b32.xlu2 %v176_v2, %s562_s28  ;;  %v650_v5 = vld [vmem:[%s170_s27 + $0x28] sm:$0xff]  ;;  %v654_v6 = vld [vmem:[%s170_s27 + $0x38] sm:$0xff]  ;;  %v656_v7 = vld [vmem:[%s170_s27 + $0x30] sm:$0xff] }
  0x21   : > { %194 = vrot.lane.b32.xlu1 %v648_v3, %s562_s28  ;;  %190 = vrot.lane.b32.xlu0 %v173_v4, %s562_s28 }
  0x22   : > { %198 = vrot.lane.b32.xlu2 %v650_v5, %s562_s28 }
  0x29   : > { %202 = vrot.lane.b32.xlu1 %v654_v6, %s562_s28  ;;  %200 = vrot.lane.b32.xlu0 %v656_v7, %s562_s28  ;;  %s421_s28 = sshll.u32 %s552_s12, 6 }
  0x2a   : > { %212 = vrot.lane.b32.xlu2 %v644_v1, %s563_s29  ;;  %s325_s4 = scalar_lea.hbm %s794_s2, %s421_s28 }
  0x2b   : > { %s328_s16 = sshll.u32 %s325_s4, 4  ;;  %s329_s16 = int_to_ptr.hbm [resolvable:$true] %s328_s16 }
  0x2c   : > { %s496_s20 = sshra.s32 %s329_s16, 4  ;;  %s497_s20 = int_to_ptr.hbm [resolvable:$true] %s496_s20 }
  0x2d   : > { %s498_s23 = scalar_lea.hbm %s497_s20, 64  ;;  %p503_p1 = scmp.lt.s32.totalorder %s497_s20, %s794_s2 }
  0x2e   : > { %p499_p12 = scmp.ne.s32.totalorder %s497_s20, %s498_s23  ;;  %p504_p2 = scmp.lt.s32.totalorder %s502_s26, %s498_s23 }
  0x30   : > { %p500_p13 = pnand %p499_p12, %p622_p4  ;;  %p505_p3 = por %p504_p2, %p503_p1 }
  0x31   : > { %216 = vrot.lane.b32.xlu1 %v642_v0, %s563_s29  ;;  %214 = vrot.lane.b32.xlu0 %v173_v4, %s563_s29 }
  0x32   : > { %218 = vrot.lane.b32.xlu2 %v648_v3, %s563_s29  ;;  %p501_p0 = pneg %p500_p13 }
  0x34   : > { %p506_p5 = pnand %p505_p3, %p501_p0 }
  0x39   : > { %222 = vrot.lane.b32.xlu1 %v650_v5, %s563_s29  ;;  %220 = vrot.lane.b32.xlu0 %v176_v2, %s563_s29 }
  0x3a   : > { %224 = vrot.lane.b32.xlu2 %v656_v7, %s563_s29 }
  0x41   : > { %236 = vrot.lane.b32.xlu1 %v644_v1, %s564_s30  ;;  %226 = vrot.lane.b32.xlu0 %v654_v6, %s563_s29 }
  0x42   : > { %238 = vrot.lane.b32.xlu2 %v173_v4, %s564_s30 }
  0x49   : > { %242 = vrot.lane.b32.xlu1 %v648_v3, %s564_s30  ;;  %240 = vrot.lane.b32.xlu0 %v642_v0, %s564_s30 }
  0x4a   : > { %244 = vrot.lane.b32.xlu2 %v176_v2, %s564_s30 }
  0x51   : > { %248 = vrot.lane.b32.xlu1 %v656_v7, %s564_s30  ;;  %246 = vrot.lane.b32.xlu0 %v650_v5, %s564_s30 }
  0x52   : > { %250 = vrot.lane.b32.xlu2 %v654_v6, %s564_s30 }
  0x74   : > { %v197_v8 = vpop.permute.xlu2 %196 }
  0x75   : > { %v265_v28 = vsel %vm260_vm0, %v176_v2, %v197_v8 }
  0x7c   : > { %v672_v9 = vpop.permute.xlu2 %198 }
  0x7d   : > { %v266_v61 = vsel %vm260_vm0, %v650_v5, %v672_v9 }
  0x84   : > { %v213_v10 = vpop.permute.xlu2 %212 }
  0x8b   : > { %v193_v11 = vpop.permute.xlu1 %192  ;;  %v189_v12 = vpop.permute.xlu0 %188 }
  0x8c   : > { %v219_v13 = vpop.permute.xlu2 %218  ;;  %v261_v35 = vsel %vm260_vm0, %v644_v1, %v189_v12  ;;  %v263_v49 = vsel %vm260_vm0, %v642_v0, %v193_v11 }
  0x8d   : > { %v270_v38 = vsel %vm269_vm2, %v261_v35, %v213_v10 }
  0x93   : > { %v195_v14 = vpop.permute.xlu1 %194  ;;  %v191_v15 = vpop.permute.xlu0 %190 }
  0x94   : > { %v674_v16 = vpop.permute.xlu2 %224  ;;  %v262_v20 = vsel %vm260_vm0, %v173_v4, %v191_v15  ;;  %v264_v48 = vsel %vm260_vm0, %v648_v3, %v195_v14 }
  0x95   : > { %v273_v52 = vsel %vm269_vm2, %v264_v48, %v219_v13 }
  0x9b   : > { %v203_v17 = vpop.permute.xlu1 %202  ;;  %v201_v18 = vpop.permute.xlu0 %200 }
  0x9c   : > { %v239_v19 = vpop.permute.xlu2 %238  ;;  %v268_v39 = vsel %vm260_vm0, %v654_v6, %v203_v17  ;;  %v267_v60 = vsel %vm260_vm0, %v656_v7, %v201_v18 }
  0x9d   : > { %v276_v0 = vsel %vm269_vm2, %v267_v60, %v674_v16 }
  0xa3   : > { %v217_v21 = vpop.permute.xlu1 %216  ;;  %v215_v22 = vpop.permute.xlu0 %214 }
  0xa4   : > { %v271_v24 = vsel %vm269_vm2, %v262_v20, %v215_v22  ;;  %v245_v27 = vpop.permute.xlu2 %244  ;;  %v272_v53 = vsel %vm269_vm2, %v263_v49, %v217_v21 }
  0xa5   : > { %v280_v25 = vsel %vm278_vm1, %v271_v24, %v239_v19 }
  0xa6   : > { %v296_v26 = vmul.f32 %v288_v23, %v280_v25 }
  0xa8   : > { %305 = vst.msk [vmem:[%s685_s7 + $0x8] sm:$0xff] %vm303_vm3, %v296_v26 }
  0xab   : > { %v223_v29 = vpop.permute.xlu1 %222  ;;  %v221_v30 = vpop.permute.xlu0 %220 }
  0xac   : > { %v274_v32 = vsel %vm269_vm2, %v265_v28, %v221_v30  ;;  %v251_v37 = vpop.permute.xlu2 %250  ;;  %v275_v1 = vsel %vm269_vm2, %v266_v61, %v223_v29 }
  0xad   : > { %v283_v33 = vsel %vm278_vm1, %v274_v32, %v245_v27 }
  0xae   : > { %v299_v34 = vmul.f32 %v291_v31, %v283_v33 }
  0xb0   : > { %308 = vst.msk [vmem:[%s685_s7 + $0x20] sm:$0xff] %vm303_vm3, %v299_v34 }
  0xb3   : > { %v237_v40 = vpop.permute.xlu1 %236  ;;  %v227_v41 = vpop.permute.xlu0 %226 }
  0xb4   : > { %v279_v43 = vsel %vm278_vm1, %v270_v38, %v237_v40  ;;  %v277_v44 = vsel %vm269_vm2, %v268_v39, %v227_v41 }
  0xb5   : > { %v295_v45 = vmul.f32 %v287_v36, %v279_v43  ;;  %v286_v46 = vsel %vm278_vm1, %v277_v44, %v251_v37 }
  0xb6   : > { %v302_v47 = vmul.f32 %v294_v42, %v286_v46 }
  0xb7   : > { %304 = vst.msk [vmem:[%s685_s7] sm:$0xff] %vm303_vm3, %v295_v45 }
  0xb8   : > { %311 = vst.msk [vmem:[%s685_s7 + $0x38] sm:$0xff] %vm303_vm3, %v302_v47 }
  0xbb   : > { %v243_v54 = vpop.permute.xlu1 %242  ;;  %v241_v55 = vpop.permute.xlu0 %240 }
  0xbc   : > { %v282_v56 = vsel %vm278_vm1, %v273_v52, %v243_v54  ;;  %v281_v57 = vsel %vm278_vm1, %v272_v53, %v241_v55 }
  0xbd   : > { %v298_v58 = vmul.f32 %v290_v50, %v282_v56  ;;  %v297_v59 = vmul.f32 %v289_v51, %v281_v57 }
  0xbf   : > { %307 = vst.msk [vmem:[%s685_s7 + $0x18] sm:$0xff] %vm303_vm3, %v298_v58 }
  0xc0   : > { %306 = vst.msk [vmem:[%s685_s7 + $0x10] sm:$0xff] %vm303_vm3, %v297_v59 }
  0xc3   : > { %v249_v2 = vpop.permute.xlu1 %248  ;;  %v247_v3 = vpop.permute.xlu0 %246 }
  0xc4   : > { %v285_v4 = vsel %vm278_vm1, %v276_v0, %v249_v2  ;;  %v284_v5 = vsel %vm278_vm1, %v275_v1, %v247_v3 }
  0xc5   : > { %v301_v6 = vmul.f32 %v293_v62, %v285_v4  ;;  %v300_v7 = vmul.f32 %v292_v63, %v284_v5 }
  0xc7   : > { %310 = vst.msk [vmem:[%s685_s7 + $0x30] sm:$0xff] %vm303_vm3, %v301_v6 }
  0xc8   : > { %309 = vst.msk [vmem:[%s685_s7 + $0x28] sm:$0xff] %vm303_vm3, %v300_v7 }
  0xc9   : > { %509 = shalt.err (!%p506_p5)
}
  0xca   : > { %s565_s3 = smov 128   ;;  %s566_s7 = smov 8  }
  0xcb   : > { %422 = dma.vmem_to_hbm [thread:$0]  (%p622_p4), %s327_s15, 1024, %s329_s16, %s313_s18, %s565_s3, %s565_s3, %s566_s7  }
  0xcc PF: > { %p428_p6 = scmp.ge.s32.totalorder %s560_s14, 2  ;;  %s343_s29 = sand.u32 1, %s540_s9  }
  0xcd   : > { %s344_s30 = scalar_lea.sflag [#allocation3], %s343_s29 }
  0xce   : > { %p425_p7 = pnand %p428_p6, %p629_p8 }
  0xd0   : > { %p426_p9 = pneg %p425_p7 }
  0xd2   : > { %535 = dma.done.wait (%p426_p9), %s344_s30, 1024  }
  0xd3   : > { %537 = vsyncadd (%p426_p9), %s344_s30, 4294966272  ;;  %s15_s14 = sadd.s32 1, %s560_s14   ;;  %s797_s9 = smov %s544_s10 }
  0xd4   : > { %p12_p10 = scmp.ge.s32.totalorder %s15_s14, 4   ;;  %s798_s10 = smov %s548_s11 }
  0xd5   : > { %s799_s11 = smov %s635_s22  ;;  %s800_s12 = smov %s556_s13 }
  0xd6   : > { %s801_s13 = smov %s803_s17  ;;  %14 = sbr.rel (!%p12_p10) target bundleno = 4 (0x4), region = 63 }
  0xdb   :  { %350 = vsyncpa [#allocation3], 1 }
  0xdc   :  { %352 = vsyncpa [#allocation3 + $0x1], 1 }

</bundles_post_ra>
